<compile_context>
chip_gen: v7x
topology: tpu7x:2x2x1
jax: 0.10.0
libtpu: 0.0.40
codegen_flags: <defaults>
</compile_context>

<pallas_src>
import math

import jax
import jax.numpy as jnp
from jax.experimental import pallas as pl
from jax.experimental.pallas import tpu as pltpu


def _discriminator_kernel(user_ref, hist_ref, gen_ref,
                          w1u_ref, w1h_ref, w1g_ref, b1_ref,
                          w2_ref, b2_ref, w3_ref, b3_ref,
                          out_ref):
    """One batch tile of the Discriminator MLP.

    Original graph:
        summary = mean(hist, axis=1)                    # history_summarizer
        x   = concat([user, summary, gen], axis=-1)
        h1  = relu(x @ W1 + b1); h2 = relu(h1 @ W2 + b2); out = h2 @ W3 + b3
    The concat and the cross-sublane mean are folded into three MXU matmuls:
    w1h_ref already holds W1's history slice tiled H times and pre-scaled by
    1/H, so hist2d @ w1h_ref == mean(hist, 1) @ W1_hist exactly.
    """
    f32 = jnp.float32
    h1 = (jnp.dot(user_ref[...], w1u_ref[...], preferred_element_type=f32)
          + jnp.dot(hist_ref[...], w1h_ref[...], preferred_element_type=f32)
          + jnp.dot(gen_ref[...], w1g_ref[...], preferred_element_type=f32)
          + b1_ref[...])
    h1 = jnp.maximum(h1, 0.0).astype(w2_ref.dtype)
    h2 = jnp.dot(h1, w2_ref[...], preferred_element_type=f32) + b2_ref[...]
    h2 = jnp.maximum(h2, 0.0).astype(w3_ref.dtype)
    out = jnp.dot(h2, w3_ref[...], preferred_element_type=f32) + b3_ref[...]
    out_ref[...] = out.astype(out_ref.dtype)


def _round_up(x, m):
    return ((x + m - 1) // m) * m


def discriminator_forward(user_id, generator_output, history,
                          user_table, item_table, params,
                          *, compute_dtype=jnp.bfloat16, batch_tile=512):
    """Forward pass matching Discriminator.forward(user_id, generator_output, history).

    user_id: [B] int32, generator_output: [B, Di] f32, history: [B, H] int32.
    params = (w1, b1, w2, b2, w3, b3), weights stored as [in, out].
    """
    w1, b1, w2, b2, w3, b3 = params
    B = user_id.shape[0]
    H = history.shape[1]
    Du = user_table.shape[1]
    Di = item_table.shape[1]
    cd = compute_dtype
    f32 = jnp.float32

    # --- parameter preprocessing (tiny) --------------------------------------
    # Split W1 by the original concat order [user | history-summary | generator].
    w1u = w1[:Du].astype(cd)                                         # [Du, L2]
    w1g = w1[Du + Di:].astype(cd)                                    # [Di, L2]
    # Fold the mean-pool into the MXU:  mean(hist,1) @ W1_h == hist2d @ w1h_rep
    w1h_rep = (jnp.tile(w1[Du:Du + Di], (H, 1)) / H).astype(cd)      # [H*Di, L2]

    # --- input preprocessing ---------------------------------------------------
    # TODO(synk): embedding gathers are still plain-JAX/XLA glue; fusing them
    # via scalar-prefetched ids + in-kernel gathers would halve history traffic.
    user_e = user_table.astype(cd)[user_id]                          # [B, Du]
    hist2d = item_table.astype(cd)[history].reshape(B, H * Di)       # [B, H*Di]
    gen_e = generator_output.astype(cd)                              # [B, Di]

    # Batch tiling: (8,128)-aligned tiles; weights stay VMEM-resident.
    tb = batch_tile if B >= batch_tile else max(8, _round_up(B, 8))
    b_pad = _round_up(B, tb)
    if b_pad != B:
        pad = ((0, b_pad - B), (0, 0))
        user_e = jnp.pad(user_e, pad)
        hist2d = jnp.pad(hist2d, pad)
        gen_e = jnp.pad(gen_e, pad)
    grid = (b_pad // tb,)

    def batch_spec(ncols):
        return pl.BlockSpec((tb, ncols), lambda i: (i, 0))

    def resident_spec(arr):
        return pl.BlockSpec(arr.shape, lambda i: (0, 0))

    w2c, w3c = w2.astype(cd), w3.astype(cd)
    b1f, b2f, b3f = b1.astype(f32), b2.astype(f32), b3.astype(f32)

    out = pl.pallas_call(
        _discriminator_kernel,
        out_shape=jax.ShapeDtypeStruct((b_pad, 1), f32),
        grid=grid,
        in_specs=[
            batch_spec(Du),            # user embeddings
            batch_spec(H * Di),        # flattened history embeddings
            batch_spec(Di),            # generator output
            resident_spec(w1u),
            resident_spec(w1h_rep),
            resident_spec(w1g),
            resident_spec(b1f),
            resident_spec(w2c),
            resident_spec(b2f),
            resident_spec(w3c),
            resident_spec(b3f),
        ],
        out_specs=batch_spec(1),
        compiler_params=pltpu.CompilerParams(
            dimension_semantics=("parallel",)),
    )(user_e, hist2d, gen_e, w1u, w1h_rep, w1g, b1f, w2c, b2f, w3c, b3f)
    return out[:B]


def _reference_forward(user_id, generator_output, history,
                       user_table, item_table, params, compute_dtype):
    """Pure-JAX reference following the original torch graph (mean-pool
    summarizer), with matmul operands quantized to the kernel's dtype."""
    w1, b1, w2, b2, w3, b3 = params
    q = lambda a: a.astype(compute_dtype).astype(jnp.float32)
    user_e = q(user_table)[user_id]
    hist_e = q(item_table)[history]
    summary = jnp.mean(hist_e, axis=1)
    x = jnp.concatenate([user_e, summary, q(generator_output)], axis=-1)
    h1 = q(jnp.maximum(x @ q(w1) + b1, 0.0))
    h2 = q(jnp.maximum(h1 @ q(w2) + b2, 0.0))
    return h2 @ q(w3) + b3


def _init_linear(key, fan_in, fan_out):
    # torch.nn.Linear default init: U(-1/sqrt(fan_in), 1/sqrt(fan_in))
    kw, kb = jax.random.split(key)
    bound = 1.0 / math.sqrt(fan_in)
    w = jax.random.uniform(kw, (fan_in, fan_out), jnp.float32, -bound, bound)
    b = jax.random.uniform(kb, (1, fan_out), jnp.float32, -bound, bound)
    return w, b


if __name__ == "__main__":
    key = jax.random.PRNGKey(0)
    (k_user_tbl, k_item_tbl, k_l1, k_l2, k_l3,
     k_uid, k_hist, k_gen) = jax.random.split(key, 8)

    # Small, module-consistent shapes.
    num_users, num_items = 32, 64
    user_dim, item_dim = 16, 16
    B, H = 8, 8

    size_l1 = user_dim + 2 * item_dim                                        # 48
    size_l2 = int(math.pow(2, round(math.log2((size_l1 + item_dim) / 2))))   # 32

    # Embedding tables (nn.Embedding default init: N(0, 1)).
    user_table = jax.random.normal(k_user_tbl, (num_users, user_dim), jnp.float32)
    item_table = jax.random.normal(k_item_tbl, (num_items, item_dim), jnp.float32)

    # MLP parameters, stored as [in, out].
    w1, b1 = _init_linear(k_l1, size_l1, size_l2)
    w2, b2 = _init_linear(k_l2, size_l2, size_l2 // 2)
    w3, b3 = _init_linear(k_l3, size_l2 // 2, 1)
    params = (w1, b1, w2, b2, w3, b3)

    # Example inputs.
    user_id = jax.random.randint(k_uid, (B,), 0, num_users)
    history = jax.random.randint(k_hist, (B, H), 0, num_items)
    generator_output = jax.random.normal(k_gen, (B, item_dim), jnp.float32)

    out = discriminator_forward(user_id, generator_output, history,
                                user_table, item_table, params)
    jax.block_until_ready(out)
    assert out.shape == (B, 1)

    ref = _reference_forward(user_id, generator_output, history,
                             user_table, item_table, params, jnp.bfloat16)
    assert jnp.allclose(out, ref, atol=2e-2, rtol=2e-2), (out, ref)
    print("KERNEL_OK")
</pallas_src>

<mosaic_0001>
module attributes {stable_mosaic.version = 11 : i64} {
  func.func @_discriminator_kernel(%arg0: i32, %arg1: memref<8x16xbf16, #tpu.memory_space<vmem>>, %arg2: memref<8x128xbf16, #tpu.memory_space<vmem>>, %arg3: memref<8x16xbf16, #tpu.memory_space<vmem>>, %arg4: memref<16x32xbf16, #tpu.memory_space<vmem>>, %arg5: memref<128x32xbf16, #tpu.memory_space<vmem>>, %arg6: memref<16x32xbf16, #tpu.memory_space<vmem>>, %arg7: memref<1x32xf32, #tpu.memory_space<vmem>>, %arg8: memref<32x16xbf16, #tpu.memory_space<vmem>>, %arg9: memref<1x16xf32, #tpu.memory_space<vmem>>, %arg10: memref<16x1xbf16, #tpu.memory_space<vmem>>, %arg11: memref<1x1xf32, #tpu.memory_space<vmem>>, %arg12: memref<8x1xf32, #tpu.memory_space<vmem>>) attributes {dimension_semantics = [#tpu.dimension_semantics<parallel>], iteration_bounds = array<i64: 1>, scalar_prefetch = 0 : i64, scratch_operands = 0 : i64, tpu.core_type = #tpu.core_type<tc>, window_params = [{transform_indices = @transform_0, window_bounds = array<i64: 8, 16>}, {transform_indices = @transform_1, window_bounds = array<i64: 8, 128>}, {transform_indices = @transform_2, window_bounds = array<i64: 8, 16>}, {pipeline_mode = #tpu.pipeline_mode<synchronous>, transform_indices = @transform_3, window_bounds = array<i64: 16, 32>}, {pipeline_mode = #tpu.pipeline_mode<synchronous>, transform_indices = @transform_4, window_bounds = array<i64: 128, 32>}, {pipeline_mode = #tpu.pipeline_mode<synchronous>, transform_indices = @transform_5, window_bounds = array<i64: 16, 32>}, {pipeline_mode = #tpu.pipeline_mode<synchronous>, transform_indices = @transform_6, window_bounds = array<i64: 1, 32>}, {pipeline_mode = #tpu.pipeline_mode<synchronous>, transform_indices = @transform_7, window_bounds = array<i64: 32, 16>}, {pipeline_mode = #tpu.pipeline_mode<synchronous>, transform_indices = @transform_8, window_bounds = array<i64: 1, 16>}, {pipeline_mode = #tpu.pipeline_mode<synchronous>, transform_indices = @transform_9, window_bounds = array<i64: 16, 1>}, {pipeline_mode = #tpu.pipeline_mode<synchronous>, transform_indices = @transform_10, window_bounds = array<i64: 1, 1>}, {transform_indices = @transform_11, window_bounds = array<i64: 8, 1>}]} {
    %c0 = arith.constant 0 : index
    %c0_0 = arith.constant 0 : index
    %0 = vector.load %arg1[%c0, %c0_0] : memref<8x16xbf16, #tpu.memory_space<vmem>>, vector<8x16xbf16>
    %c0_1 = arith.constant 0 : index
    %c0_2 = arith.constant 0 : index
    %1 = vector.load %arg4[%c0_1, %c0_2] : memref<16x32xbf16, #tpu.memory_space<vmem>>, vector<16x32xbf16>
    %cst = arith.constant dense<0.000000e+00> : vector<8x32xf32>
    %2 = tpu.matmul %0, %1, %cst {dimension_numbers = #tpu.dot_dimension_numbers<[1], [0], [0], [1], [0, 0, 1, 1], [], []>} : vector<8x16xbf16>, vector<16x32xbf16>, vector<8x32xf32> -> vector<8x32xf32>
    %c0_3 = arith.constant 0 : index
    %c0_4 = arith.constant 0 : index
    %3 = vector.load %arg2[%c0_3, %c0_4] : memref<8x128xbf16, #tpu.memory_space<vmem>>, vector<8x128xbf16>
    %c0_5 = arith.constant 0 : index
    %c0_6 = arith.constant 0 : index
    %4 = vector.load %arg5[%c0_5, %c0_6] : memref<128x32xbf16, #tpu.memory_space<vmem>>, vector<128x32xbf16>
    %cst_7 = arith.constant dense<0.000000e+00> : vector<8x32xf32>
    %5 = tpu.matmul %3, %4, %cst_7 {dimension_numbers = #tpu.dot_dimension_numbers<[1], [0], [0], [1], [0, 0, 1, 1], [], []>} : vector<8x128xbf16>, vector<128x32xbf16>, vector<8x32xf32> -> vector<8x32xf32>
    %6 = arith.addf %2, %5 : vector<8x32xf32>
    %c0_8 = arith.constant 0 : index
    %c0_9 = arith.constant 0 : index
    %7 = vector.load %arg3[%c0_8, %c0_9] : memref<8x16xbf16, #tpu.memory_space<vmem>>, vector<8x16xbf16>
    %c0_10 = arith.constant 0 : index
    %c0_11 = arith.constant 0 : index
    %8 = vector.load %arg6[%c0_10, %c0_11] : memref<16x32xbf16, #tpu.memory_space<vmem>>, vector<16x32xbf16>
    %cst_12 = arith.constant dense<0.000000e+00> : vector<8x32xf32>
    %9 = tpu.matmul %7, %8, %cst_12 {dimension_numbers = #tpu.dot_dimension_numbers<[1], [0], [0], [1], [0, 0, 1, 1], [], []>} : vector<8x16xbf16>, vector<16x32xbf16>, vector<8x32xf32> -> vector<8x32xf32>
    %10 = arith.addf %6, %9 : vector<8x32xf32>
    %c0_13 = arith.constant 0 : index
    %c0_14 = arith.constant 0 : index
    %11 = vector.load %arg7[%c0_13, %c0_14] : memref<1x32xf32, #tpu.memory_space<vmem>>, vector<1x32xf32>
    %12 = vector.broadcast %11 : vector<1x32xf32> to vector<8x32xf32>
    %13 = arith.addf %10, %12 : vector<8x32xf32>
    %cst_15 = arith.constant 0.000000e+00 : f32
    %14 = vector.broadcast %cst_15 : f32 to vector<8x32xf32>
    %15 = arith.maximumf %13, %14 : vector<8x32xf32>
    %16 = arith.truncf %15 : vector<8x32xf32> to vector<8x32xbf16>
    %c0_16 = arith.constant 0 : index
    %c0_17 = arith.constant 0 : index
    %17 = vector.load %arg8[%c0_16, %c0_17] : memref<32x16xbf16, #tpu.memory_space<vmem>>, vector<32x16xbf16>
    %cst_18 = arith.constant dense<0.000000e+00> : vector<8x16xf32>
    %18 = tpu.matmul %16, %17, %cst_18 {dimension_numbers = #tpu.dot_dimension_numbers<[1], [0], [0], [1], [0, 0, 1, 1], [], []>} : vector<8x32xbf16>, vector<32x16xbf16>, vector<8x16xf32> -> vector<8x16xf32>
    %c0_19 = arith.constant 0 : index
    %c0_20 = arith.constant 0 : index
    %19 = vector.load %arg9[%c0_19, %c0_20] : memref<1x16xf32, #tpu.memory_space<vmem>>, vector<1x16xf32>
    %20 = vector.broadcast %19 : vector<1x16xf32> to vector<8x16xf32>
    %21 = arith.addf %18, %20 : vector<8x16xf32>
    %cst_21 = arith.constant 0.000000e+00 : f32
    %22 = vector.broadcast %cst_21 : f32 to vector<8x16xf32>
    %23 = arith.maximumf %21, %22 : vector<8x16xf32>
    %24 = arith.truncf %23 : vector<8x16xf32> to vector<8x16xbf16>
    %c0_22 = arith.constant 0 : index
    %c0_23 = arith.constant 0 : index
    %25 = vector.load %arg10[%c0_22, %c0_23] : memref<16x1xbf16, #tpu.memory_space<vmem>>, vector<16x1xbf16>
    %cst_24 = arith.constant dense<0.000000e+00> : vector<8x1xf32>
    %26 = tpu.matmul %24, %25, %cst_24 {dimension_numbers = #tpu.dot_dimension_numbers<[1], [0], [0], [1], [0, 0, 1, 1], [], []>} : vector<8x16xbf16>, vector<16x1xbf16>, vector<8x1xf32> -> vector<8x1xf32>
    %c0_25 = arith.constant 0 : index
    %c0_26 = arith.constant 0 : index
    %27 = vector.load %arg11[%c0_25, %c0_26] : memref<1x1xf32, #tpu.memory_space<vmem>>, vector<1x1xf32>
    %28 = vector.broadcast %27 : vector<1x1xf32> to vector<8x1xf32>
    %29 = arith.addf %26, %28 : vector<8x1xf32>
    %c0_27 = arith.constant 0 : index
    %c0_28 = arith.constant 0 : index
    %30 = vector.load %arg12[%c0_27, %c0_28] : memref<8x1xf32, #tpu.memory_space<vmem>>, vector<8x1xf32>
    tpu.vector_store %arg12[%c0_27, %c0_28], %29 {strides = array<i32>} : memref<8x1xf32, #tpu.memory_space<vmem>>, vector<8x1xf32>,
    return
  }
  func.func @transform_0(%arg0: i32) -> (i32, i32) {
    %c0_i32 = arith.constant 0 : i32
    %c0_i32_0 = arith.constant 0 : i32
    return %arg0, %c0_i32 : i32, i32
  }
  func.func @transform_1(%arg0: i32) -> (i32, i32) {
    %c0_i32 = arith.constant 0 : i32
    %c0_i32_0 = arith.constant 0 : i32
    return %arg0, %c0_i32 : i32, i32
  }
  func.func @transform_2(%arg0: i32) -> (i32, i32) {
    %c0_i32 = arith.constant 0 : i32
    %c0_i32_0 = arith.constant 0 : i32
    return %arg0, %c0_i32 : i32, i32
  }
  func.func @transform_3(%arg0: i32) -> (i32, i32) {
    %c0_i32 = arith.constant 0 : i32
    %c0_i32_0 = arith.constant 0 : i32
    %c0_i32_1 = arith.constant 0 : i32
    return %c0_i32, %c0_i32_0 : i32, i32
  }
  func.func @transform_4(%arg0: i32) -> (i32, i32) {
    %c0_i32 = arith.constant 0 : i32
    %c0_i32_0 = arith.constant 0 : i32
    %c0_i32_1 = arith.constant 0 : i32
    return %c0_i32, %c0_i32_0 : i32, i32
  }
  func.func @transform_5(%arg0: i32) -> (i32, i32) {
    %c0_i32 = arith.constant 0 : i32
    %c0_i32_0 = arith.constant 0 : i32
    %c0_i32_1 = arith.constant 0 : i32
    return %c0_i32, %c0_i32_0 : i32, i32
  }
  func.func @transform_6(%arg0: i32) -> (i32, i32) {
    %c0_i32 = arith.constant 0 : i32
    %c0_i32_0 = arith.constant 0 : i32
    %c0_i32_1 = arith.constant 0 : i32
    return %c0_i32, %c0_i32_0 : i32, i32
  }
  func.func @transform_7(%arg0: i32) -> (i32, i32) {
    %c0_i32 = arith.constant 0 : i32
    %c0_i32_0 = arith.constant 0 : i32
    %c0_i32_1 = arith.constant 0 : i32
    return %c0_i32, %c0_i32_0 : i32, i32
  }
  func.func @transform_8(%arg0: i32) -> (i32, i32) {
    %c0_i32 = arith.constant 0 : i32
    %c0_i32_0 = arith.constant 0 : i32
    %c0_i32_1 = arith.constant 0 : i32
    return %c0_i32, %c0_i32_0 : i32, i32
  }
  func.func @transform_9(%arg0: i32) -> (i32, i32) {
    %c0_i32 = arith.constant 0 : i32
    %c0_i32_0 = arith.constant 0 : i32
    %c0_i32_1 = arith.constant 0 : i32
    return %c0_i32, %c0_i32_0 : i32, i32
  }
  func.func @transform_10(%arg0: i32) -> (i32, i32) {
    %c0_i32 = arith.constant 0 : i32
    %c0_i32_0 = arith.constant 0 : i32
    %c0_i32_1 = arith.constant 0 : i32
    return %c0_i32, %c0_i32_0 : i32, i32
  }
  func.func @transform_11(%arg0: i32) -> (i32, i32) {
    %c0_i32 = arith.constant 0 : i32
    %c0_i32_0 = arith.constant 0 : i32
    return %arg0, %c0_i32 : i32, i32
  }
}

</mosaic_0001>

<bundles_post_ra>
// kernel: tpu_custom_call.1
= control target key start
LH: loop header
LB: loop body
LE: loop exit
PB: predicated region body
PF: predicated region fallthrough
CT: control target
= control target key end

     0   :  { %v494_v0 = vmov 0.0   ;;  %vm495_vm0 = vmmov 0   ;;  %vm155_vm1 = vcmask 130048   ;;  %vm285_vm2 = vcmask 261120   ;;  %s642_s4 = inlined_call_operand.vmem [shape: bf16[128,32], index: 4, kind: input, shape index: {}]   ;;  %s643_s3 = inlined_call_operand.vmem [shape: bf16[16,32], index: 3, kind: input, shape index: {}]   ;;  %s644_s0 = inlined_call_operand.vmem [shape: bf16[8,16], index: 0, kind: input, shape index: {}]   ;;  %s645_s5 = inlined_call_operand.vmem [shape: bf16[16,32], index: 5, kind: input, shape index: {}]   ;;  %s646_s2 = inlined_call_operand.vmem [shape: bf16[8,16], index: 2, kind: input, shape index: {}]   ;;  %s647_s1 = inlined_call_operand.vmem [shape: bf16[8,128], index: 1, kind: input, shape index: {}]   ;;  %s648_s7 = inlined_call_operand.vmem [shape: bf16[32,16], index: 7, kind: input, shape index: {}]   ;;  %s649_s9 = inlined_call_operand.vmem [shape: bf16[16,1], index: 9, kind: input, shape index: {}]   ;;  %s650_s6 = inlined_call_operand.vmem [shape: f32[1,32], index: 6, kind: input, shape index: {}]   ;;  %s651_s10 = inlined_call_operand.<no memory space> [shape: f32[1,1], index: 10, kind: input, shape index: {}]   ;;  %s652_s8 = inlined_call_operand.vmem [shape: f32[1,16], index: 8, kind: input, shape index: {}]   ;;  %s653_s11 = inlined_call_operand.vmem [shape: f32[8,1], index: 11, kind: output, shape index: {}]  }
   0x1   :  { %433 = vmatprep.subr.bf16.mxu0 %v494_v0  ;;  %v481_v1 = vld [vmem:[%s642_s4] sm:$0xff]   ;;  %453 = vmatprep.subr.bf16.mxu1 %v494_v0  ;;  %v482_v2 = vld [vmem:[%s642_s4 + $0x8] sm:$0xff]   ;;  %v483_v4 = vld [vmem:[%s642_s4 + $0x10] sm:$0xff]   ;;  %v16_v35 = vstv %s651_s10  ;;  %vm389_vm3 = vcmask 7168  }
   0x2   :  { %455 = vmatprep.mubr.msk.bf16.mxu1 %vm495_vm0, %v494_v0  ;;  %449 = vmatprep.mubr.msk.bf16.mxu0 %vm495_vm0, %v494_v0  ;;  %v486_v3 = vld [vmem:[%s643_s3] sm:$0xff]   ;;  %v484_v7 = vld [vmem:[%s642_s4 + $0x18] sm:$0xff]   ;;  %v487_v10 = vld [vmem:[%s642_s4 + $0x28] sm:$0xff]   ;;  %17 = vst [vmem:[#allocation2] sm:$0x1] %v16_v35 }
   0x3   :  { %434 = vmatpush3.bf16.msra.mxu0 %v481_v1  ;;  %454 = vmatpush3.bf16.msra.mxu1 %v486_v3  ;;  %v41_v5 = vld [vmem:[%s644_s0] sm:$0xf]  ;;  %v488_v11 = vld [vmem:[%s642_s4 + $0x30] sm:$0xff]   ;;  %v490_v12 = vld [vmem:[%s642_s4 + $0x38] sm:$0xff]  }
   0x4   :  { %435 = vmatprep.subr.bf16.mxu0 %v494_v0  ;;  %459 = vmatprep.subr.bf16.mxu1 %v494_v0  ;;  %v489_v6 = vld [vmem:[%s645_s5] sm:$0xff]   ;;  %v492_v15 = vld [vmem:[%s648_s7 + $0x8] sm:$0xff]  }
   0x5   :  { %v485_v8 = vld [vmem:[%s642_s4 + $0x20] sm:$0xff]  }
   0x6   :  { %456 = vmatmul.mubr.msk.bf16.vlgmr.msra.gmra.mrb[0].mxu1 %vm155_vm1, %v41_v5  ;;  %v199_v9 = vld [vmem:[%s646_s2] sm:$0xf] }
   0x7   :  { %436 = vmatpush3.bf16.msra.mxu0 %v482_v2  ;;  %460 = vmatpush3.bf16.msra.mxu1 %v489_v6  ;;  %v44_v13 = vld [vmem:[%s647_s1] sm:$0xf] }
   0x8   :  { %437 = vmatprep.subr.bf16.mxu0 %v494_v0  ;;  %461 = vmatprep.mubr.msk.bf16.mxu1 %vm495_vm0, %v494_v0  ;;  %v491_v14 = vld [vmem:[%s648_s7] sm:$0xff]  }
   0x9   :  { %465 = vmatprep.subr.bf16.mxu1 %v494_v0  ;;  %v407_v27 = vld [vmem:[%s650_s6] ss:$0 sm:$0xff] }
   0xa   :  { %v493_v33 = vld [vmem:[%s649_s9] sm:$0xff]  }
   0xb   :  { %438 = vmatpush3.bf16.msra.mxu0 %v483_v4  ;;  %v408_v36 = vld [vmem:[%s652_s8] ss:$0 sm:$0xff] }
   0xc   :  { %439 = vmatprep.subr.bf16.mxu0 %v494_v0  ;;  %v412_v44 = vld [vmem:[#allocation2] ss:$0 sm:$0xff] }
   0xe   :  { %462 = vmatmul.mubr.msk.bf16.vlgmr.msra.gmra.mrb[4].mxu1 %vm155_vm1, %v199_v9 }
   0xf   :  { %440 = vmatpush3.bf16.msra.mxu0 %v484_v7  ;;  %469 = vmatprep.mubr.msk.bf16.mxu1 %vm495_vm0, %v494_v0 }
  0x10   :  { %441 = vmatprep.subr.bf16.mxu0 %v494_v0  ;;  %466 = vmatpush3.bf16.msra.mxu1 %v491_v14 }
  0x11   :  { %467 = vmatprep.subr.bf16.mxu1 %v494_v0 }
  0x13   :  { %442 = vmatpush3.bf16.msra.mxu0 %v485_v8 }
  0x14   :  { %443 = vmatprep.subr.bf16.mxu0 %v494_v0  ;;  %468 = vmatpush3.bf16.msra.mxu1 %v492_v15 }
  0x15   :  { %473 = vmatprep.subr.bf16.mxu1 %v494_v0 }
  0x17   :  { %444 = vmatpush3.bf16.msra.mxu0 %v487_v10 }
  0x18   :  { %445 = vmatprep.subr.bf16.mxu0 %v494_v0 }
  0x1b   :  { %446 = vmatpush3.bf16.msra.mxu0 %v488_v11 }
  0x1c   :  { %447 = vmatprep.subr.bf16.mxu0 %v494_v0 }
  0x1f   :  { %448 = vmatpush3.bf16.msra.mxu0 %v490_v12 }
  0x22   :  { %450 = vmatmul.mubr.bf16.vlgmr.msra.gmra.mrb[0].mxu0 %v44_v13 }
  0xd9   :  { %v193_v16 = vpop.f32.mrb[0].mxu1 }
  0xda   :  { %v457_v17 = vpop.f32.mrb[1].mxu1 }
  0xdb   :  { %v196_v18 = vpop.f32.mrb[2].mxu1 }
  0xdc   :  { %v458_v19 = vpop.f32.mrb[3].mxu1 }
  0xe1   :  { %v245_v20 = vpop.f32.mrb[4].mxu1 }
  0xe2   :  { %v463_v21 = vpop.f32.mrb[5].mxu1 }
  0xe3   :  { %v248_v22 = vpop.f32.mrb[6].mxu1 }
  0xe4   :  { %v464_v23 = vpop.f32.mrb[7].mxu1 }
  0xf5   :  { %v143_v24 = vpop.f32.mrb[0].mxu0 }
  0xf6   :  { %v194_v25 = vadd.f32 %v193_v16, %v143_v24  ;;  %v451_v26 = vpop.f32.mrb[1].mxu0 }
  0xf7   :  { %v146_v28 = vpop.f32.mrb[2].mxu0 }
  0xf8   :  { %v251_v29 = vadd.f32 %v245_v20, %v194_v25  ;;  %v452_v30 = vpop.f32.mrb[3].mxu0 }
  0xfa   :  { %v259_v31 = vadd.f32 %v407_v27, %v251_v29 }
  0xfc   :  { %v260_v32 = vmax.f32 %v259_v31, 0.0 }
  0xfe   :  { %v261_v34 = vpack.c.bf16 %v260_v32, %v260_v32 }
 0x100   :  { %470 = vmatmul.mubr.msk.bf16.vlgmr.msra.gmra.mrb[8].mxu1 %vm285_vm2, %v261_v34 }
 0x101   :  { %474 = vmatpush3.bf16.msra.mxu1 %v493_v33  ;;  %475 = vmatprep.mubr.msk.bf16.mxu1 %vm495_vm0, %v494_v0 }
 0x1d3   :  { %v323_v37 = vpop.f32.mrb[8].mxu1 }
 0x1d4   :  { %v324_v38 = vadd.f32 %v408_v36, %v323_v37  ;;  %v471_v39 = vpop.f32.mrb[9].mxu1 }
 0x1d5   :  { %v326_v40 = vpop.f32.mrb[10].mxu1 }
 0x1d6   :  { %v329_v41 = vmax.f32 %v324_v38, 0.0  ;;  %v472_v42 = vpop.f32.mrb[11].mxu1 }
 0x1d8   :  { %v330_v43 = vpack.c.bf16 %v329_v41, %v329_v41 }
 0x1da   :  { %476 = vmatmul.mubr.msk.bf16.vlgmr.msra.gmra.mrb[12].mxu1 %vm155_vm1, %v330_v43 }
 0x2ad   :  { %v383_v45 = vpop.f32.mrb[12].mxu1 }
 0x2ae   :  { %v384_v46 = vadd.f32 %v412_v44, %v383_v45  ;;  %v477_v47 = vpop.f32.mrb[13].mxu1 }
 0x2af   :  { %v386_v48 = vpop.f32.mrb[14].mxu1 }
 0x2b0   :  { %390 = vst.msk [vmem:[%s653_s11] sm:$0xff] %vm389_vm3, %v384_v46  ;;  %v478_v49 = vpop.f32.mrb[15].mxu1 }

</bundles_post_ra>
